<compile_context>
chip_gen: v7x
topology: tpu7x:2x2x1
jax: 0.10.0
libtpu: 0.0.40
codegen_flags: <defaults>
</compile_context>

<pallas_src>
import functools

import jax
import jax.numpy as jnp
from jax.experimental import pallas as pl
from jax.experimental.pallas import tpu as pltpu


def _round_up(x, m):
    return ((x + m - 1) // m) * m


def _spectral_norm_weight(weight, u, eps=1e-12):
    """One power iteration, matching torch.nn.utils.spectral_norm semantics."""
    c_out = weight.shape[0]
    w_mat = weight.reshape(c_out, -1)                      # (Cout, Cin*KH*KW)
    v = w_mat.T @ u
    v = v / (jnp.linalg.norm(v) + eps)
    u_new = w_mat @ v
    u_new = u_new / (jnp.linalg.norm(u_new) + eps)
    sigma = u_new @ (w_mat @ v)
    return weight / sigma, u_new


def _from_rgb_kernel(xa_ref, xb_ref, w_ref, b_ref, o_ref, ext_ref, k_ref, *,
                     tile_p, halo, wp, n_taps, cin, k_pad):
    # xa_ref : (1, Cin, tile_p)      current pixel tile of flat padded image (bf16)
    # xb_ref : (1, Cin, halo)        right halo = first `halo` lanes of next tile (bf16)
    # w_ref  : (Cout, k_pad)         spectral-normalized taps, K zero-padded (bf16)
    # b_ref  : (Cout, 1)             bias (f32)
    # o_ref  : (1, Cout, tile_p)     output tile, pixel axis lane-dense
    # ext_ref: (Cin, tile_p+halo)    VMEM scratch: tile + right halo (bf16)
    # k_ref  : (k_pad, tile_p)       VMEM scratch: fused-K RHS (bf16)
    ext_ref[:, :tile_p] = xa_ref[0]
    ext_ref[:, tile_p:] = xb_ref[0]

    k_used = n_taps * cin
    if k_pad > k_used:
        # zero padded K rows every step (scratch is uninitialized VMEM)
        k_ref[k_used:, :] = jnp.zeros((k_pad - k_used, tile_p), k_ref.dtype)

    # 9 static lane-shifted copies (lower to XLU rotates, store slot stays free)
    for t in range(n_taps):                       # statically unrolled
        ky, kx = divmod(t, 3)
        s = ky * wp + kx                          # static lane shift
        k_ref[cin * t:cin * (t + 1), :] = ext_ref[:, s:s + tile_p]

    # one fused MXU matmul, accumulation stays inside the MXU
    acc = jnp.dot(w_ref[...], k_ref[...], preferred_element_type=jnp.float32)
    acc = acc + b_ref[...]                        # (Cout, 1) broadcast over lanes
    o_ref[0] = jnp.where(acc >= 0.0, acc, 0.2 * acc).astype(o_ref.dtype)


def from_rgb_block(x_nchw, weight, bias, u, *, tile_p=8192,
                   out_dtype=jnp.bfloat16, crop=True, return_new_u=False):
    """Forward pass of FROM_RGB_Block.

    x_nchw: (N, 3, H, W) f32   weight: (Cout, 3, 3, 3)   bias: (Cout,)
    u: (Cout,) spectral-norm power-iteration vector.
    Returns (N, Cout, H, W) in `out_dtype` (or (N, Cout, H, W+2) if crop=False).
    """
    N, Cin, H, W = x_nchw.shape
    Cout, Cin_w, KH, KW = weight.shape
    assert Cin == Cin_w == 3 and KH == 3 and KW == 3
    Hp, Wp = H + 2, W + 2
    n_taps = KH * KW
    k_used = n_taps * Cin                      # 27
    k_pad = _round_up(k_used, 32)              # 32: sublane-dense bf16 RHS

    # ---- spectral norm (tiny matvec glue; also yields updated u) ----
    w_sn, u_new = _spectral_norm_weight(weight, u)
    # (Cout, K) with K index k = (ky*3 + kx)*Cin + c, zero-padded to k_pad
    w_k = jnp.transpose(w_sn, (2, 3, 1, 0)).reshape(k_used, Cout).T
    w_k = jnp.pad(w_k, ((0, 0), (0, k_pad - k_used))).astype(jnp.bfloat16)
    b2d = bias.reshape(Cout, 1).astype(jnp.float32)

    # ---- implicit im2col on a flat padded image ----
    # Output position p = h*Wp + w; tap (ky,kx) reads p + ky*Wp + kx.
    # Columns w in {W, W+1} are junk, cropped afterwards (or by the consumer).
    halo = _round_up(2 * Wp + 2, 128)                       # lanes taps read past the tile
    tile_p = _round_up(max(min(tile_p, H * Wp), halo), halo)  # multiple of halo (and 128)
    if N == 1:
        # v7x megacore: expose >= 2 parallel grid steps for single-image calls
        half = _round_up(-(-(H * Wp) // 2), halo)
        tile_p = min(tile_p, max(half, halo))
    J = int(pl.cdiv(H * Wp, tile_p))
    L = J * tile_p + halo                                   # halo of last tile stays in-bounds
    ratio = tile_p // halo                                  # exact by construction

    xpad = jnp.pad(x_nchw, ((0, 0), (0, 0), (1, 1), (1, 1)))
    xflat = xpad.reshape(N, Cin, Hp * Wp).astype(jnp.bfloat16)
    xflat = jnp.pad(xflat, ((0, 0), (0, 0), (0, L - Hp * Wp)))

    kernel = functools.partial(_from_rgb_kernel, tile_p=tile_p, halo=halo,
                               wp=Wp, n_taps=n_taps, cin=Cin, k_pad=k_pad)

    out_bytes = jnp.dtype(out_dtype).itemsize
    flops = 2 * N * H * W * Cout * Cin * n_taps
    bytes_accessed = (N * Cin * J * (tile_p + halo) * 2     # main + halo streams (bf16)
                      + w_k.size * 2 + b2d.size * 4
                      + N * Cout * J * tile_p * out_bytes)  # output stream

    out_full = pl.pallas_call(
        kernel,
        out_shape=jax.ShapeDtypeStruct((N, Cout, J * tile_p), out_dtype),
        grid_spec=pltpu.PrefetchScalarGridSpec(
            num_scalar_prefetch=0,
            grid=(N, J),
            in_specs=[
                # current tile and its right halo: two views of the same flat image
                pl.BlockSpec((1, Cin, tile_p), lambda n, j: (n, 0, j)),
                pl.BlockSpec((1, Cin, halo), lambda n, j: (n, 0, (j + 1) * ratio)),
                pl.BlockSpec((Cout, k_pad), lambda n, j: (0, 0)),
                pl.BlockSpec((Cout, 1), lambda n, j: (0, 0)),
            ],
            out_specs=pl.BlockSpec((1, Cout, tile_p), lambda n, j: (n, 0, j)),
            scratch_shapes=[
                pltpu.VMEM((Cin, tile_p + halo), jnp.bfloat16),
                pltpu.VMEM((k_pad, tile_p), jnp.bfloat16),
            ],
        ),
        compiler_params=pltpu.CompilerParams(
            dimension_semantics=("parallel", "parallel")),
        cost_estimate=pl.CostEstimate(flops=flops, transcendentals=0,
                                      bytes_accessed=bytes_accessed),
    )(xflat, xflat, w_k, b2d)

    out = out_full[:, :, :H * Wp].reshape(N, Cout, H, Wp)
    if crop:
        out = out[:, :, :, :W]
    # TODO(synk): for W % 128 == 0, tile over row-blocks and emit (1,Cout,R,W)
    # directly so the junk-column crop (an extra HBM pass) disappears entirely.
    if return_new_u:
        return out, u_new
    return out


def _reference(x_nchw, weight, bias, u):
    """Pure-JAX reference with the same bf16-activation numerics as the kernel."""
    w_sn, _ = _spectral_norm_weight(weight, u)
    y = jax.lax.conv_general_dilated(
        x_nchw.astype(jnp.bfloat16), w_sn.astype(jnp.bfloat16),
        window_strides=(1, 1), padding=((1, 1), (1, 1)),
        dimension_numbers=("NCHW", "OIHW", "NCHW"),
        preferred_element_type=jnp.float32)
    y = y + bias[None, :, None, None]
    return jnp.where(y >= 0.0, y, 0.2 * y)


if __name__ == "__main__":
    key = jax.random.PRNGKey(0)
    k_x, k_w, k_b, k_u = jax.random.split(key, 4)

    N, Cin, H, W = 2, 3, 16, 16        # RGB input (module fixes Cin = 3)
    c_out = 32

    x = jax.random.normal(k_x, (N, Cin, H, W), dtype=jnp.float32)
    weight = jax.random.normal(k_w, (c_out, Cin, 3, 3), dtype=jnp.float32) * 0.1
    bias = jax.random.normal(k_b, (c_out,), dtype=jnp.float32) * 0.1
    u = jax.random.normal(k_u, (c_out,), dtype=jnp.float32)
    u = u / jnp.linalg.norm(u)

    out = jax.block_until_ready(from_rgb_block(x, weight, bias, u))
    ref = jax.block_until_ready(_reference(x, weight, bias, u))

    assert out.shape == (N, c_out, H, W)
    diff = jnp.max(jnp.abs(out.astype(jnp.float32) - ref))
    assert jnp.allclose(out.astype(jnp.float32), ref, rtol=2e-2, atol=2e-2), (
        "mismatch vs reference, max abs diff = " + str(float(diff)))

    print("KERNEL_OK")
</pallas_src>

<mosaic_0001>
module attributes {stable_mosaic.version = 11 : i64} {
  func.func @_from_rgb_kernel(%arg0: i32, %arg1: i32, %arg2: memref<1x3x384xbf16, #tpu.memory_space<vmem>>, %arg3: memref<1x3x128xbf16, #tpu.memory_space<vmem>>, %arg4: memref<32x32xbf16, #tpu.memory_space<vmem>>, %arg5: memref<32x1xf32, #tpu.memory_space<vmem>>, %arg6: memref<1x32x384xbf16, #tpu.memory_space<vmem>>, %arg7: memref<3x512xbf16, #tpu.memory_space<vmem>>, %arg8: memref<32x384xbf16, #tpu.memory_space<vmem>>) attributes {dimension_semantics = [#tpu.dimension_semantics<parallel>, #tpu.dimension_semantics<parallel>], iteration_bounds = array<i64: 2, 1>, scalar_prefetch = 0 : i64, scratch_operands = 2 : i64, tpu.core_type = #tpu.core_type<tc>, window_params = [{transform_indices = @transform_0, window_bounds = array<i64: 1, 3, 384>}, {transform_indices = @transform_1, window_bounds = array<i64: 1, 3, 128>}, {pipeline_mode = #tpu.pipeline_mode<synchronous>, transform_indices = @transform_2, window_bounds = array<i64: 32, 32>}, {pipeline_mode = #tpu.pipeline_mode<synchronous>, transform_indices = @transform_3, window_bounds = array<i64: 32, 1>}, {transform_indices = @transform_4, window_bounds = array<i64: 1, 32, 384>}]} {
    %c0 = arith.constant 0 : index
    %c0_0 = arith.constant 0 : index
    %c0_1 = arith.constant 0 : index
    %0 = vector.load %arg2[%c0, %c0_0, %c0_1] : memref<1x3x384xbf16, #tpu.memory_space<vmem>>, vector<1x3x384xbf16>
    %1 = vector.shape_cast %0 : vector<1x3x384xbf16> to vector<3x384xbf16>
    %c0_2 = arith.constant 0 : index
    %c0_3 = arith.constant 0 : index
    %2 = vector.load %arg7[%c0_2, %c0_3] : memref<3x512xbf16, #tpu.memory_space<vmem>>, vector<3x384xbf16>
    tpu.vector_store %arg7[%c0_2, %c0_3], %1 {strides = array<i32>} : memref<3x512xbf16, #tpu.memory_space<vmem>>, vector<3x384xbf16>,
    %c0_4 = arith.constant 0 : index
    %c0_5 = arith.constant 0 : index
    %c0_6 = arith.constant 0 : index
    %3 = vector.load %arg3[%c0_4, %c0_5, %c0_6] : memref<1x3x128xbf16, #tpu.memory_space<vmem>>, vector<1x3x128xbf16>
    %4 = vector.shape_cast %3 : vector<1x3x128xbf16> to vector<3x128xbf16>
    %c0_7 = arith.constant 0 : index
    %c384 = arith.constant 384 : index
    %5 = vector.load %arg7[%c0_7, %c384] : memref<3x512xbf16, #tpu.memory_space<vmem>>, vector<3x128xbf16>
    tpu.vector_store %arg7[%c0_7, %c384], %4 {strides = array<i32>} : memref<3x512xbf16, #tpu.memory_space<vmem>>, vector<3x128xbf16>,
    %cst = arith.constant 0.000000e+00 : bf16
    %6 = vector.broadcast %cst : bf16 to vector<5x384xbf16>
    %c27 = arith.constant 27 : index
    %c0_8 = arith.constant 0 : index
    %7 = vector.load %arg8[%c27, %c0_8] : memref<32x384xbf16, #tpu.memory_space<vmem>>, vector<5x384xbf16>
    tpu.vector_store %arg8[%c27, %c0_8], %6 {strides = array<i32>} : memref<32x384xbf16, #tpu.memory_space<vmem>>, vector<5x384xbf16>,
    %c0_9 = arith.constant 0 : index
    %c0_10 = arith.constant 0 : index
    %8 = vector.load %arg7[%c0_9, %c0_10] : memref<3x512xbf16, #tpu.memory_space<vmem>>, vector<3x384xbf16>
    %c0_11 = arith.constant 0 : index
    %c0_12 = arith.constant 0 : index
    %9 = vector.load %arg8[%c0_11, %c0_12] : memref<32x384xbf16, #tpu.memory_space<vmem>>, vector<3x384xbf16>
    tpu.vector_store %arg8[%c0_11, %c0_12], %8 {strides = array<i32>} : memref<32x384xbf16, #tpu.memory_space<vmem>>, vector<3x384xbf16>,
    %c0_13 = arith.constant 0 : index
    %c1 = arith.constant 1 : index
    %10 = vector.load %arg7[%c0_13, %c1] : memref<3x512xbf16, #tpu.memory_space<vmem>>, vector<3x384xbf16>
    %c3 = arith.constant 3 : index
    %c0_14 = arith.constant 0 : index
    %11 = vector.load %arg8[%c3, %c0_14] : memref<32x384xbf16, #tpu.memory_space<vmem>>, vector<3x384xbf16>
    tpu.vector_store %arg8[%c3, %c0_14], %10 {strides = array<i32>} : memref<32x384xbf16, #tpu.memory_space<vmem>>, vector<3x384xbf16>,
    %c0_15 = arith.constant 0 : index
    %c2 = arith.constant 2 : index
    %12 = vector.load %arg7[%c0_15, %c2] : memref<3x512xbf16, #tpu.memory_space<vmem>>, vector<3x384xbf16>
    %c6 = arith.constant 6 : index
    %c0_16 = arith.constant 0 : index
    %13 = vector.load %arg8[%c6, %c0_16] : memref<32x384xbf16, #tpu.memory_space<vmem>>, vector<3x384xbf16>
    tpu.vector_store %arg8[%c6, %c0_16], %12 {strides = array<i32>} : memref<32x384xbf16, #tpu.memory_space<vmem>>, vector<3x384xbf16>,
    %c0_17 = arith.constant 0 : index
    %c18 = arith.constant 18 : index
    %14 = vector.load %arg7[%c0_17, %c18] : memref<3x512xbf16, #tpu.memory_space<vmem>>, vector<3x384xbf16>
    %c9 = arith.constant 9 : index
    %c0_18 = arith.constant 0 : index
    %15 = vector.load %arg8[%c9, %c0_18] : memref<32x384xbf16, #tpu.memory_space<vmem>>, vector<3x384xbf16>
    tpu.vector_store %arg8[%c9, %c0_18], %14 {strides = array<i32>} : memref<32x384xbf16, #tpu.memory_space<vmem>>, vector<3x384xbf16>,
    %c0_19 = arith.constant 0 : index
    %c19 = arith.constant 19 : index
    %16 = vector.load %arg7[%c0_19, %c19] : memref<3x512xbf16, #tpu.memory_space<vmem>>, vector<3x384xbf16>
    %c12 = arith.constant 12 : index
    %c0_20 = arith.constant 0 : index
    %17 = vector.load %arg8[%c12, %c0_20] : memref<32x384xbf16, #tpu.memory_space<vmem>>, vector<3x384xbf16>
    tpu.vector_store %arg8[%c12, %c0_20], %16 {strides = array<i32>} : memref<32x384xbf16, #tpu.memory_space<vmem>>, vector<3x384xbf16>,
    %c0_21 = arith.constant 0 : index
    %c20 = arith.constant 20 : index
    %18 = vector.load %arg7[%c0_21, %c20] : memref<3x512xbf16, #tpu.memory_space<vmem>>, vector<3x384xbf16>
    %c15 = arith.constant 15 : index
    %c0_22 = arith.constant 0 : index
    %19 = vector.load %arg8[%c15, %c0_22] : memref<32x384xbf16, #tpu.memory_space<vmem>>, vector<3x384xbf16>
    tpu.vector_store %arg8[%c15, %c0_22], %18 {strides = array<i32>} : memref<32x384xbf16, #tpu.memory_space<vmem>>, vector<3x384xbf16>,
    %c0_23 = arith.constant 0 : index
    %c36 = arith.constant 36 : index
    %20 = vector.load %arg7[%c0_23, %c36] : memref<3x512xbf16, #tpu.memory_space<vmem>>, vector<3x384xbf16>
    %c18_24 = arith.constant 18 : index
    %c0_25 = arith.constant 0 : index
    %21 = vector.load %arg8[%c18_24, %c0_25] : memref<32x384xbf16, #tpu.memory_space<vmem>>, vector<3x384xbf16>
    tpu.vector_store %arg8[%c18_24, %c0_25], %20 {strides = array<i32>} : memref<32x384xbf16, #tpu.memory_space<vmem>>, vector<3x384xbf16>,
    %c0_26 = arith.constant 0 : index
    %c37 = arith.constant 37 : index
    %22 = vector.load %arg7[%c0_26, %c37] : memref<3x512xbf16, #tpu.memory_space<vmem>>, vector<3x384xbf16>
    %c21 = arith.constant 21 : index
    %c0_27 = arith.constant 0 : index
    %23 = vector.load %arg8[%c21, %c0_27] : memref<32x384xbf16, #tpu.memory_space<vmem>>, vector<3x384xbf16>
    tpu.vector_store %arg8[%c21, %c0_27], %22 {strides = array<i32>} : memref<32x384xbf16, #tpu.memory_space<vmem>>, vector<3x384xbf16>,
    %c0_28 = arith.constant 0 : index
    %c38 = arith.constant 38 : index
    %24 = vector.load %arg7[%c0_28, %c38] : memref<3x512xbf16, #tpu.memory_space<vmem>>, vector<3x384xbf16>
    %c24 = arith.constant 24 : index
    %c0_29 = arith.constant 0 : index
    %25 = vector.load %arg8[%c24, %c0_29] : memref<32x384xbf16, #tpu.memory_space<vmem>>, vector<3x384xbf16>
    tpu.vector_store %arg8[%c24, %c0_29], %24 {strides = array<i32>} : memref<32x384xbf16, #tpu.memory_space<vmem>>, vector<3x384xbf16>,
    %c0_30 = arith.constant 0 : index
    %c0_31 = arith.constant 0 : index
    %26 = vector.load %arg4[%c0_30, %c0_31] : memref<32x32xbf16, #tpu.memory_space<vmem>>, vector<32x32xbf16>
    %c0_32 = arith.constant 0 : index
    %c0_33 = arith.constant 0 : index
    %27 = vector.load %arg8[%c0_32, %c0_33] : memref<32x384xbf16, #tpu.memory_space<vmem>>, vector<32x384xbf16>
    %cst_34 = arith.constant dense<0.000000e+00> : vector<32x384xf32>
    %28 = tpu.matmul %26, %27, %cst_34 {dimension_numbers = #tpu.dot_dimension_numbers<[1], [0], [0], [1], [0, 0, 1, 1], [], []>} : vector<32x32xbf16>, vector<32x384xbf16>, vector<32x384xf32> -> vector<32x384xf32>
    %c0_35 = arith.constant 0 : index
    %c0_36 = arith.constant 0 : index
    %29 = vector.load %arg5[%c0_35, %c0_36] : memref<32x1xf32, #tpu.memory_space<vmem>>, vector<32x1xf32>
    %30 = vector.broadcast %29 : vector<32x1xf32> to vector<32x384xf32>
    %31 = arith.addf %28, %30 : vector<32x384xf32>
    %cst_37 = arith.constant 0.000000e+00 : f32
    %32 = vector.broadcast %cst_37 : f32 to vector<32x384xf32>
    %33 = arith.cmpf oge, %31, %32 : vector<32x384xf32>
    %cst_38 = arith.constant 2.000000e-01 : f32
    %34 = vector.broadcast %cst_38 : f32 to vector<32x384xf32>
    %35 = arith.mulf %34, %31 : vector<32x384xf32>
    %36 = arith.select %33, %31, %35 : vector<32x384xi1>, vector<32x384xf32>
    %37 = arith.truncf %36 : vector<32x384xf32> to vector<32x384xbf16>
    %c0_39 = arith.constant 0 : index
    %c0_40 = arith.constant 0 : index
    %c0_41 = arith.constant 0 : index
    %38 = vector.load %arg6[%c0_39, %c0_40, %c0_41] : memref<1x32x384xbf16, #tpu.memory_space<vmem>>, vector<1x32x384xbf16>
    %39 = vector.shape_cast %38 : vector<1x32x384xbf16> to vector<32x384xbf16>
    %40 = vector.shape_cast %37 : vector<32x384xbf16> to vector<1x32x384xbf16>
    tpu.vector_store %arg6[%c0_39, %c0_40, %c0_41], %40 {strides = array<i32>} : memref<1x32x384xbf16, #tpu.memory_space<vmem>>, vector<1x32x384xbf16>,
    return
  }
  func.func @transform_0(%arg0: i32, %arg1: i32) -> (i32, i32, i32) {
    %c0_i32 = arith.constant 0 : i32
    %c0_i32_0 = arith.constant 0 : i32
    return %arg0, %c0_i32, %arg1 : i32, i32, i32
  }
  func.func @transform_1(%arg0: i32, %arg1: i32) -> (i32, i32, i32) {
    %c1_i32 = arith.constant 1 : i32
    %0 = arith.addi %arg1, %c1_i32 : i32
    %c3_i32 = arith.constant 3 : i32
    %1 = arith.muli %0, %c3_i32 : i32
    %c0_i32 = arith.constant 0 : i32
    %c0_i32_0 = arith.constant 0 : i32
    return %arg0, %c0_i32, %1 : i32, i32, i32
  }
  func.func @transform_2(%arg0: i32, %arg1: i32) -> (i32, i32) {
    %c0_i32 = arith.constant 0 : i32
    %c0_i32_0 = arith.constant 0 : i32
    %c0_i32_1 = arith.constant 0 : i32
    return %c0_i32, %c0_i32_0 : i32, i32
  }
  func.func @transform_3(%arg0: i32, %arg1: i32) -> (i32, i32) {
    %c0_i32 = arith.constant 0 : i32
    %c0_i32_0 = arith.constant 0 : i32
    %c0_i32_1 = arith.constant 0 : i32
    return %c0_i32, %c0_i32_0 : i32, i32
  }
  func.func @transform_4(%arg0: i32, %arg1: i32) -> (i32, i32, i32) {
    %c0_i32 = arith.constant 0 : i32
    %c0_i32_0 = arith.constant 0 : i32
    return %arg0, %c0_i32, %arg1 : i32, i32, i32
  }
}

</mosaic_0001>

<bundles_post_ra>
// kernel: tpu_custom_call.1
= control target key start
LH: loop header
LB: loop body
LE: loop exit
PB: predicated region body
PF: predicated region fallthrough
CT: control target
= control target key end

     0   :  { %9 = vsyncpa [#allocation5], 0  ;;  %s1889_s0 = inlined_call_operand.vmem [shape: bf16[2,3,512], index: 0, kind: input, shape index: {}]   ;;  %s1890_s1 = inlined_call_operand.vmem [shape: bf16[2,3,512], index: 1, kind: input, shape index: {}]   ;;  %s1891_s2 = inlined_call_operand.vmem [shape: bf16[32,32], index: 2, kind: input, shape index: {}]   ;;  %s1892_s3 = inlined_call_operand.vmem [shape: f32[32,1], index: 3, kind: input, shape index: {}]   ;;  %s1893_s4 = inlined_call_operand.hbm [shape: bf16[2,32,384], index: 4, kind: output, shape index: {}]  }
   0x1   :  { %11 = vsyncpa [#allocation5 + $0x1], 0  ;;  %s1464_s15 = smov 0   ;;  %s1466_s16 = smov 0  }
   0x2   :  { %s1468_s17 = smov 0   ;;  %s1470_s18 = smov 0  }
   0x3   :  { %s1472_s19 = smov 0   ;;  %s1474_s20 = smov 0  }
   0x4 LB: > { %s1215_s21 = sadd.s32 4294967295, %s1424_s20   ;;  %s1216_s22 = sadd.s32 4294967294, %s1424_s20   ;;  %s1424_s20 = sphi %s1474_s20, %s17_s20   ;;  %s1420_s19 = sphi %s1472_s19, %s1920_s19   ;;  %s1416_s18 = sphi %s1470_s18, %s1919_s18   ;;  %s1412_s17 = sphi %s1468_s17, %s1918_s17   ;;  %s1408_s16 = sphi %s1466_s16, %s1917_s16   ;;  %s1404_s15 = sphi %s1464_s15, %s1916_s15  }
   0x5   : > { %s29_s23 = sadd.s32 1, %s1420_s19  ;;  %s140_s24 = sadd.s32 1, %s1412_s17 }
   0x6   : > { %p31_p0 = scmp.ge.s32.totalorder %s29_s23, 2  ;;  %p150_p1 = scmp.ne.s32.totalorder %s1412_s17, %s1408_s16 }
   0x7   : > { %p151_p2 = scmp.eq.s32.totalorder %s1215_s21, 1  ;;  %p156_p3 = scmp.ne.s32.totalorder %s1408_s16, %s1404_s15 }
   0x8   : > { %s1922_s23 = smov (%p31_p0, %s29_s23), 0  ;;  %p157_p5 = scmp.eq.s32.totalorder %s1216_s22, 1 }
   0x9   : > { %p1504_p4 = por %p151_p2, %p150_p1  ;;  %s135_s26 = ssub.s32 %s1420_s19, %s1922_s23 }
   0xa   : > { %p1219_p6 = scmp.ge.s32.totalorder %s1424_s20, 1  ;;  %p138_p7 = scmp.eq.s32.totalorder %s135_s26, 0 }
   0xb   : > { %p1511_p8 = por %p157_p5, %p156_p3  ;;  %p217_p9 = scmp.lt.s32.totalorder %s1424_s20, 3 }
   0xc   : > { %s1517_s28 = scalar_select %p138_p7, %s1412_s17, %s140_s24  }
   0xd   : > { %p218_p10 = pnand %p1219_p6, %p217_p9 }
   0xe   : > { %p266_p11 = scmp.lt.s32.totalorder (!%p218_p10), %s1416_s18, 1  ;;  %vm294_vm0 = vcmask (!%p218_p10), 1041408   ;;  %vm295_vm1 = vsmask.f32 (!%p218_p10), 1280  ;;  %vm297_vm2 = vcmask (!%p218_p10), 1043458   ;;  %vm301_vm5 = vcmask (!%p218_p10), 1045508  }
   0xf   : > { %221 = sbr.rel (%p218_p10) target bundleno = 472 (0x1d8), region = 36  ;;  %vm1520_vm3 = vmand (!%p218_p10), %vm294_vm0, %vm295_vm1  ;;  %vm298_vm4 = vsmask.f32 (!%p218_p10), 3328  ;;  %vm302_vm6 = vsmask.f32 (!%p218_p10), 5376  ;;  %v330_v6 = vlaneseq (!%p218_p10)  ;;  %s1427_s12 = smov (!%p218_p10), 109  }
  0x10   : > { %vm299_vm7 = vmand (!%p218_p10), %vm297_vm2, %vm298_vm4  ;;  %v305_v1 = vld [vmem:[#allocation2] sm:$0x3f] (!%p218_p10)  ;;  %v309_v3 = vld [vmem:[#allocation2 + $0x6] sm:$0x3] (!%p218_p10)  ;;  %v1426_v4 = vmov (!%p218_p10), 1983009808  }
  0x11   : > { %vm300_vm8 = vmor (!%p218_p10), %vm299_vm7, %vm1520_vm3  ;;  %v328_v5 = vunpack.c.l.s4 (!%p218_p10), %v1426_v4  ;;  %v331_v12 = vshrl.u32 (!%p218_p10), %v330_v6, 7  ;;  %s1428_s13 = smov (!%p218_p10), 126   ;;  %s1429_s14 = smov (!%p218_p10), 92   ;;  %v345_v52 = vld [vmem:[#allocation3] sm:$0x3] (!%p218_p10)  ;;  %vm312_vm11 = vcmask (!%p218_p10), 1047557  }
  0x12   : > { %vm1529_vm9 = vmand (!%p218_p10), %vm301_vm5, %vm302_vm6  ;;  %s1430_s21 = smov (!%p218_p10), 127   ;;  %v348_v56 = vld [vmem:[#allocation3 + $0x8] sm:$0x3] (!%p218_p10)  ;;  %s1431_s22 = smov (!%p218_p10), 110   ;;  %vm313_vm12 = vsmask.f32 (!%p218_p10), 7958 }
  0x13   : > { %vm304_vm10 = vmor (!%p218_p10), %vm1529_vm9, %vm300_vm8  ;;  %v329_v11 = vunpack.c.0.s8 (!%p218_p10), %v328_v5  ;;  %s1432_s24 = smov (!%p218_p10), 108   ;;  %s1433_s26 = smov (!%p218_p10), 91   ;;  %vm909_vm14 = vcmask (!%p218_p10), 261120   ;;  %vm593_vm15 = vcmask (!%p218_p10), 1047558   ;;  %vm594_vm0 = vsmask.f32 (!%p218_p10), 7424 }
  0x14   : > { %vm1612_vm13 = vmand (!%p218_p10), %vm312_vm11, %vm313_vm12  ;;  %vm586_vm1 = vcmask (!%p218_p10), 891904   ;;  %vm470_vm4 = vcmask (!%p218_p10), 1044483   ;;  %vm471_vm6 = vsmask.f32 (!%p218_p10), 4352  ;;  %vm463_vm7 = vcmask (!%p218_p10), 1031168   ;;  %s1436_s9 = smov (!%p218_p10), [#allocation4]  }
  0x15   : > { %v1543_v13 = vsub.s32 (!%p218_p10), %v329_v11, %v331_v12  ;;  %vm1695_vm8 = vmand (!%p218_p10), %vm470_vm4, %vm471_vm6  ;;  %vm734_vm11 = vsmask.f32 (!%p218_p10), 2304  ;;  %vm727_vm12 = vcmask (!%p218_p10), 752640   ;;  %vm541_vm4 = vcmask (!%p218_p10), 900096   ;;  %s1350_s10 = sshll.u32 (!%p218_p10), %s1436_s9, 4  ;;  %s1351_s10 = int_to_ptr.vmem [resolvable:$false] %s1350_s10 }
  0x16   : > { %s267_s29 = scalar_select %p266_p11, %s1416_s18, 1 }
  0x18   : > { %s1241_s30 = sshll.u32 %s267_s29, 3  ;;  %s1434_s29 = smov 90  }
  0x19   : > { %s273_s7 = scalar_lea.vmem %s1889_s0, %s1241_s30  ;;  %s1243_s8 = sadd.s32 6, %s1241_s30 }
  0x1a   : > { %s288_s11 = scalar_lea.vmem %s1890_s1, %s1243_s8  ;;  %v293_v7 = vld [vmem:[%s273_s7] sm:$0x3f] }
  0x1b   : > { %v306_v8 = vsel %vm304_vm10, %v293_v7, %v305_v1  ;;  %v308_v9 = vld [vmem:[%s288_s11] sm:$0x3]  ;;  %v318_v1 = vld [vmem:[#allocation3 + $0x20] sm:$0xe0]  ;;  %vm420_vm10 = vcmask 1042433   ;;  %s1352_s11 = scalar_lea.vmem %s1351_s10, 1536 }
  0x1c   : > { %307 = vst [vmem:[#allocation2] sm:$0x3f] %v306_v8  ;;  %v310_v10 = vsel %vm1520_vm3, %v308_v9, %v309_v3  ;;  %v319_v5 = vsel %vm1612_vm13, 0, %v318_v1  ;;  %v315_v9 = vld [vmem:[#allocation3 + $0x18] sm:$0xe0] }
  0x1d   : > { %311 = vst [vmem:[#allocation2 + $0x6] sm:$0x3] %v310_v10  ;;  %320 = vst [vmem:[#allocation3 + $0x20] sm:$0xe0] %v319_v5  ;;  %v316_v10 = vsel %vm1612_vm13, 0, %v315_v9 }
  0x1e   : > { %317 = vst [vmem:[#allocation3 + $0x18] sm:$0xe0] %v316_v10  ;;  %v479_v10 = vld [vmem:[#allocation3 + $0x10] sm:$0x18] }
  0x23   : > { %v324_v42 = vld [vmem:[#allocation2] sm:$0x3f] }
  0x24   : > { %v559_v14 = vld [vmem:[#allocation2] sm:$0xff]  ;;  %v333_v49 = vrot.slane %v324_v42, %v1543_v13  ;;  %v326_v11 = vcombine.high %v324_v42, %v324_v42 }
  0x25   : > { %v1546_v15 = vrot.slane %v559_v14, %v1543_v13  ;;  %v561_v16 = vcombine.low %v559_v14, %v559_v14  ;;  %v698_v20 = vcombine.high %v559_v14, %v559_v14 }
  0x26   : > { %v341_v57 = vcombine.high %v333_v49, %v333_v49  ;;  %v346_v61 = vsel %vm1520_vm3, %v333_v49, %v345_v52  ;;  %v602_v52 = vld [vmem:[#allocation3 + $0x10] sm:$0xc0] }
  0x27   : > { %584 = vrot.lane.b32.xlu0 %v1546_v15, %s1427_s12  ;;  %v568_v17 = vrot.slane %v561_v16, %v1543_v13  ;;  %v451_v18 = vrot.slane %v1546_v15, 5  ;;  %v1553_v19 = vcombine.low %v1546_v15, %v1546_v15  ;;  %v715_v21 = vrot.slane %v1546_v15, 7  ;;  %347 = vst [vmem:[#allocation3] sm:$0x3] %v346_v61 }
  0x28   : > { %v449_v22 = vcombine.high %v1546_v15, %v1546_v15  ;;  %v1560_v24 = vrot.slane %v698_v20, %v1543_v13  ;;  %v1588_v43 = vshrl.u32 %v1546_v15, 16  ;;  %v1594_v47 = vshll.u32 %v1546_v15, 16  ;;  %v351_v20 = vld [vmem:[#allocation3 + $0x10] sm:$0x3] }
  0x29   : > { %580 = vrot.lane.b32.xlu1 %v568_v17, %s1427_s12  ;;  %v576_v23 = vcombine.low %v568_v17, %v568_v17  ;;  %v349_v62 = vsel %vm1520_vm3, %v341_v57, %v348_v56  ;;  %v340_v17 = vrot.slane %v326_v11, %v1543_v13 }
  0x2a   : > { %v452_v25 = vrot.slane %v449_v22, 5  ;;  %v717_v26 = vrot.slane %v1560_v24, 7  ;;  %v1566_v27 = vcombine.high %v1560_v24, %v1560_v24  ;;  %v1568_v28 = vshrl.u32 %v449_v22, 16  ;;  %350 = vst [vmem:[#allocation3 + $0x8] sm:$0x3] %v349_v62 }
  0x2b   : > { %455 = vrot.lane.b32.xlu0 %v451_v18, %s1428_s13  ;;  %v1570_v29 = vshll.u32 %v449_v22, 16  ;;  %v453_v30 = vrot.slane %v1560_v24, 5  ;;  %v1574_v31 = vshrl.u32 %v1560_v24, 16  ;;  %v1577_v32 = vshll.u32 %v1560_v24, 16 }
  0x2c   : > { %v454_v33 = vrot.slane %v1566_v27, 5  ;;  %v384_v34 = vrot.slane %v1568_v28, 6  ;;  %v716_v36 = vrot.slane %v449_v22, 7  ;;  %v512_v39 = vrot.slane %v1568_v28, 3 }
  0x2d   : > { %582 = vrot.lane.b32.xlu1 %v1553_v19, %s1427_s12  ;;  %v387_v35 = vrot.slane %v1570_v29, 7  ;;  %v392_v37 = vrot.slane %v1574_v31, 6  ;;  %v395_v38 = vrot.slane %v1577_v32, 7  ;;  %v515_v40 = vrot.slane %v1570_v29, 4 }
  0x2e   : > { %v520_v45 = vrot.slane %v1574_v31, 3  ;;  %v523_v46 = vrot.slane %v1577_v32, 4  ;;  %v631_v50 = vrot.slane %v1570_v29, 1  ;;  %v635_v51 = vrot.slane %v1577_v32, 1 }
  0x2f   : > { %719 = vrot.lane.b32.xlu0 %v715_v21, %s1429_s14  ;;  %v388_v41 = vor.u32 %v387_v35, %v384_v34  ;;  %v396_v44 = vor.u32 %v395_v38, %v392_v37  ;;  %v516_v48 = vor.u32 %v515_v40, %v512_v39  ;;  %v376_v54 = vrot.slane %v1588_v43, 6 }
  0x30   : > { %v524_v53 = vor.u32 %v523_v46, %v520_v45  ;;  %v379_v55 = vrot.slane %v1594_v47, 7  ;;  %v1334_v58 = vpack.i.bf16 %v635_v51, %v631_v50  ;;  %v504_v59 = vrot.slane %v1588_v43, 3  ;;  %v876_v45 = vld [vmem:[%s1892_s3 + $0x8] sm:$0xff]  ;;  %v877_v46 = vld [vmem:[%s1892_s3 + $0x10] sm:$0xff] }
  0x31   : > { %578 = vrot.lane.b32.xlu1 %v576_v23, %s1427_s12  ;;  %v507_v60 = vrot.slane %v1594_v47, 4  ;;  %v627_v6 = vrot.slane %v1594_v47, 1  ;;  %v775_v7 = vrot.slane %v1568_v28, 5  ;;  %v778_v8 = vrot.slane %v1570_v29, 6 }
  0x32   : > { %v380_v63 = vor.u32 %v379_v55, %v376_v54  ;;  %v718_v12 = vrot.slane %v1566_v27, 7  ;;  %v783_v14 = vrot.slane %v1574_v31, 5  ;;  %v786_v16 = vrot.slane %v1577_v32, 6 }
  0x33   : > { %457 = vrot.lane.b32.xlu0 %v452_v25, %s1428_s13  ;;  %v508_v3 = vor.u32 %v507_v60, %v504_v59  ;;  %v779_v18 = vor.u32 %v778_v8, %v775_v7  ;;  %v352_v21 = vsel %vm1520_vm3, %v340_v17, %v351_v20  ;;  %v840_v23 = vcombine.low %v1560_v24, %v1560_v24  ;;  %vm1684_vm3 = vmand %vm593_vm15, %vm594_vm0  ;;  %v596_v59 = vld [vmem:[#allocation3] sm:$0xc0]  ;;  %v476_v7 = vld [vmem:[#allocation3 + $0x8] sm:$0x18] }
  0x34   : > { %v787_v22 = vor.u32 %v786_v16, %v783_v14  ;;  %353 = vst [vmem:[#allocation3 + $0x10] sm:$0x3] %v352_v21  ;;  %v645_v13 = vor.u32 %v631_v50, %v1568_v28  ;;  %v767_v0 = vrot.slane %v1588_v43, 5  ;;  %v770_v25 = vrot.slane %v1594_v47, 6  ;;  %v736_v17 = vld [vmem:[#allocation3 + $0x18] sm:$0x6] }
  0x35   : > { %723 = vrot.lane.b32.xlu1 %v717_v26, %s1429_s14  ;;  %v321_v26 = vld [vmem:[#allocation3 + $0x28] sm:$0xe0]  ;;  %v398_v32 = vshrl.u32 %v1566_v27, 16  ;;  %v642_v35 = vor.u32 %v627_v6, %v1588_v43  ;;  %v1435_v38 = vmov 0   ;;  %vm421_vm15 = vsmask.f32 7942 }
  0x36   : > { %v322_v29 = vsel %vm1612_vm13, 0, %v321_v26  ;;  %948 = vmatprep.mubr.bf16.mxu0 %v1435_v38  ;;  %1339 = vset.pattern.permute.xlu1 %v1435_v38  ;;  %vm1711_vm13 = vmand %vm420_vm10, %vm734_vm11  ;;  %vm413_vm0 = vcmask 1039360   ;;  %vm811_vm11 = vsmask.f32 7946 }
  0x37   : > { %459 = vrot.lane.b32.xlu0 %v453_v30, %s1428_s13  ;;  %v648_v30 = vor.u32 %v635_v51, %v1574_v31  ;;  %323 = vst [vmem:[#allocation3 + $0x28] sm:$0xe0] %v322_v29  ;;  %v400_v28 = vrot.slane %v398_v32, 6  ;;  %v1655_v31 = vld [vmem:[%s1891_s2] sm:$0xff]   ;;  %v791_v40 = vrot.slane %v398_v32, 5 }
  0x38   : > { %1261 = vmatprep.mubr.msk.bf16.mxu1 %vm909_vm14, %v1655_v31  ;;  %1340 = vset.pattern.permute.xlu0 %v1435_v38  ;;  %v599_v51 = vld [vmem:[#allocation3 + $0x8] sm:$0xc0]  ;;  %v426_v29 = vld [vmem:[#allocation3 + $0x8] sm:$0x6] }
  0x39   : > { %461 = vrot.lane.b32.xlu1 %v454_v33, %s1428_s13  ;;  %v401_v33 = vshll.u32 %v1566_v27, 16 }
  0x3b   : > { %721 = vrot.lane.b32.xlu0 %v716_v36, %s1429_s14  ;;  %v403_v34 = vrot.slane %v401_v33, 7  ;;  %v528_v36 = vrot.slane %v398_v32, 3  ;;  %v531_v37 = vrot.slane %v401_v33, 4 }
  0x3d   : > { %407 = vrot.lane.b32.xlu1 %v388_v41, %s1430_s21  ;;  %v404_v27 = vor.u32 %v403_v34, %v400_v28  ;;  %v532_v39 = vor.u32 %v531_v37, %v528_v36  ;;  %v794_v41 = vrot.slane %v401_v33, 6 }
  0x3f   : > { %409 = vrot.lane.b32.xlu0 %v396_v44, %s1430_s21  ;;  %v795_v42 = vor.u32 %v794_v41, %v791_v40  ;;  %v875_v44 = vld [vmem:[%s1892_s3] sm:$0xff]  ;;  %v423_v41 = vld [vmem:[#allocation3] sm:$0x6] }
  0x41   : > { %535 = vrot.lane.b32.xlu1 %v516_v48, %s1431_s22 }
  0x43   : > { %537 = vrot.lane.b32.xlu0 %v524_v53, %s1431_s22 }
  0x45   : > { %1335 = vrot.lane.b32.xlu1 %v1334_v58, %s1432_s24 }
  0x47   : > { %405 = vrot.lane.b32.xlu0 %v380_v63, %s1430_s21  ;;  %v473_v63 = vld [vmem:[#allocation3] sm:$0x18] }
  0x49   : > { %533 = vrot.lane.b32.xlu1 %v508_v3, %s1431_s22 }
  0x4b   : > { %652 = vrot.lane.b32.xlu0 %v627_v6, %s1432_s24 }
  0x4d   : > { %725 = vrot.lane.b32.xlu1 %v718_v12, %s1429_s14 }
  0x4f   : > { %798 = vrot.lane.b32.xlu0 %v779_v18, %s1433_s26  ;;  %v739_v18 = vld [vmem:[#allocation3 + $0x20] sm:$0x6] }
  0x51   : > { %800 = vrot.lane.b32.xlu1 %v787_v22, %s1433_s26 }
  0x53   : > { %843 = vrot.lane.b32.xlu0 %v1546_v15, %s1434_s29  ;;  %v771_v15 = vor.u32 %v770_v25, %v767_v0 }
  0x55   : > { %845 = vrot.lane.b32.xlu1 %v840_v23, %s1434_s29 }
  0x57   : > { %662 = vrot.lane.b32.xlu0 %v645_v13, %s1432_s24 }
  0x59   : > { %664 = vrot.lane.b32.xlu1 %v648_v30, %s1432_s24 }
  0x5b   : > { %796 = vrot.lane.b32.xlu0 %v771_v15, %s1433_s26 }
  0x5d   : > { %841 = vrot.lane.b32.xlu1 %v1553_v19, %s1434_s29  ;;  %v639_v19 = vrot.slane %v401_v33, 1 }
  0x5f   : > { %660 = vrot.lane.b32.xlu0 %v642_v35, %s1432_s24  ;;  %v651_v43 = vor.u32 %v639_v19, %v398_v32 }
  0x61   : > { %411 = vrot.lane.b32.xlu1 %v404_v27, %s1430_s21 }
  0x63   : > { %539 = vrot.lane.b32.xlu0 %v532_v39, %s1431_s22  ;;  %s258_s22 = sand.u32 1, %s1408_s16  }
  0x64   : > { %s1843_s7 = scalar_lea.sflag [#allocation5], %s258_s22 }
  0x65   : > { %658 = vrot.lane.b32.xlu1 %v639_v19, %s1432_s24 }
  0x67   : > { %802 = vrot.lane.b32.xlu0 %v795_v42, %s1433_s26 }
  0x69   : > { %847 = vrot.lane.b32.xlu1 %v1560_v24, %s1434_s29  ;;  %v878_v24 = vld [vmem:[%s1892_s3 + $0x18] sm:$0xff]  ;;  %s1266_s29 = smul.u32 768, %s1416_s18 }
  0x6b   : > { %666 = vrot.lane.b32.xlu0 %v651_v43, %s1432_s24  ;;  %s1265_s24 = smul.u32 48, %s258_s22  ;;  %s1834_s6 = scalar_lea.hbm %s1893_s4, %s1266_s29 }
  0x6d   : > { %881 = vperm.xlu1 %1339, %v875_v44   ;;  %s1822_s26 = scalar_lea.vmem [#allocation4], %s1265_s24 }
  0x6e   : > { %s1118_s30 = sshll.u32 %s1822_s26, 4  ;;  %s1836_s30 = int_to_ptr.vmem [resolvable:$true] %s1118_s30 }
  0x6f   : > { %886 = vperm.xlu0 %1340, %v876_v45   ;;  %s1346_s8 = scalar_lea.vmem %s1836_s30, 768  ;;  %p1353_p1 = scmp.lt.s32.totalorder %s1836_s30, %s1351_s10 }
  0x70   : > { %p1347_p12 = scmp.ne.s32.totalorder %s1836_s30, %s1346_s8  ;;  %p1354_p2 = scmp.lt.s32.totalorder %s1352_s11, %s1346_s8 }
  0x71   : > { %891 = vperm.xlu1 %1339, %v877_v46  }
  0x72   : > { %p1348_p13 = pnand %p1347_p12, %p1504_p4  ;;  %p1355_p3 = por %p1354_p2, %p1353_p1 }
  0x74   : > { %p1349_p0 = pneg %p1348_p13 }
  0x75   : > { %896 = vperm.xlu1 %1339, %v878_v24  }
  0x76   : > { %p1356_p5 = pnand %p1355_p3, %p1349_p0 }
  0x99   : > { %v585_v47 = vpop.permute.xlu0 %584 }
  0x9b   : > { %v581_v48 = vpop.permute.xlu1 %580 }
  0x9d   : > { %v456_v49 = vpop.permute.xlu0 %455 }
  0x9f   : > { %v583_v53 = vpop.permute.xlu1 %582 }
  0xa0   : > { %v588_v54 = vsel %vm586_vm1, %v581_v48, %v583_v53  ;;  %v589_v55 = vsel %vm586_vm1, %v583_v53, %v585_v47 }
  0xa1   : > { %v600_v56 = vsel %vm1684_vm3, %v588_v54, %v599_v51  ;;  %v603_v57 = vsel %vm1684_vm3, %v589_v55, %v602_v52  ;;  %v720_v58 = vpop.permute.xlu0 %719  ;;  %v742_v54 = vld [vmem:[#allocation3 + $0x28] sm:$0x6] }
  0xa2   : > { %601 = vst [vmem:[#allocation3 + $0x8] sm:$0xc0] %v600_v56  ;;  %604 = vst [vmem:[#allocation3 + $0x10] sm:$0xc0] %v603_v57 }
  0xa3   : > { %v579_v60 = vpop.permute.xlu1 %578 }
  0xa4   : > { %v587_v61 = vsel %vm586_vm1, %v579_v60, %v581_v48  ;;  %vm1725_vm1 = vmand %vm420_vm10, %vm421_vm15  ;;  %vm668_vm10 = vcmask 883712   ;;  %vm804_vm15 = vcmask 744448  }
  0xa5   : > { %v597_v1 = vsel %vm1684_vm3, %v587_v61, %v596_v59  ;;  %v458_v3 = vpop.permute.xlu0 %457  ;;  %vm548_vm3 = vsmask.f32 7954 }
  0xa6   : > { %598 = vst [vmem:[#allocation3] sm:$0xc0] %v597_v1  ;;  %v464_v4 = vsel %vm463_vm7, %v456_v49, %v458_v3  ;;  %vm1736_vm6 = vmand %vm301_vm5, %vm548_vm3 }
  0xa7   : > { %v474_v5 = vsel %vm1695_vm8, %v464_v4, %v473_v63  ;;  %v1704_v6 = vpop.permute.xlu1 %723  ;;  %vm1773_vm3 = vmand %vm297_vm2, %vm811_vm11 }
  0xa8   : > { %475 = vst [vmem:[#allocation3] sm:$0x18] %v474_v5  ;;  %v859_v5 = vld [vmem:[#allocation3 + $0x20] sm:$0x30] }
  0xa9   : > { %v460_v8 = vpop.permute.xlu0 %459  ;;  %v687_v45 = vld [vmem:[#allocation3 + $0x8] sm:$0x80] }
  0xaa   : > { %v465_v9 = vsel %vm463_vm7, %v458_v3, %v460_v8 }
  0xab   : > { %v477_v11 = vsel %vm1695_vm8, %v465_v9, %v476_v7  ;;  %v462_v12 = vpop.permute.xlu1 %461 }
  0xac   : > { %478 = vst [vmem:[#allocation3 + $0x8] sm:$0x18] %v477_v11  ;;  %v466_v14 = vsel %vm463_vm7, %v460_v8, %v462_v12  ;;  %vm681_vm7 = vcmask 1047559  }
  0xad   : > { %v480_v20 = vsel %vm1695_vm8, %v466_v14, %v479_v10  ;;  %v722_v21 = vpop.permute.xlu0 %721  ;;  %vm682_vm8 = vsmask.f32 7966  ;;  %v684_v52 = vld [vmem:[#allocation3] sm:$0x80] }
  0xae   : > { %481 = vst [vmem:[#allocation3 + $0x10] sm:$0x18] %v480_v20  ;;  %v728_v22 = vsel %vm727_vm12, %v720_v58, %v722_v21  ;;  %v729_v23 = vsel %vm727_vm12, %v722_v21, %v1704_v6  ;;  %vm1750_vm5 = vmand %vm681_vm7, %vm682_vm8 }
  0xaf   : > { %v737_v13 = vsel %vm1711_vm13, %v728_v22, %v736_v17  ;;  %v740_v0 = vsel %vm1711_vm13, %v729_v23, %v739_v18  ;;  %v408_v25 = vpop.permute.xlu1 %407  ;;  %v550_v48 = vld [vmem:[#allocation3] sm:$0x30]  ;;  %v856_v18 = vld [vmem:[#allocation3 + $0x18] sm:$0x30] }
  0xb0   : > { %738 = vst [vmem:[#allocation3 + $0x18] sm:$0x6] %v737_v13  ;;  %741 = vst [vmem:[#allocation3 + $0x20] sm:$0x6] %v740_v0 }
  0xb1   : > { %v1729_v30 = vpop.permute.xlu0 %409 }
  0xb2   : > { %v415_v32 = vsel %vm413_vm0, %v408_v25, %v1729_v30 }
  0xb3   : > { %v427_v33 = vsel %vm1725_vm1, %v415_v32, %v426_v29  ;;  %v536_v15 = vpop.permute.xlu1 %535  ;;  %v553_v35 = vld [vmem:[#allocation3 + $0x8] sm:$0x30] }
  0xb4   : > { %428 = vst [vmem:[#allocation3 + $0x8] sm:$0x6] %v427_v33 }
  0xb5   : > { %v1740_v34 = vpop.permute.xlu0 %537 }
  0xb6   : > { %v543_v36 = vsel %vm541_vm4, %v536_v15, %v1740_v34 }
  0xb7   : > { %v554_v37 = vsel %vm1736_vm6, %v543_v36, %v553_v35  ;;  %v1746_v27 = vpop.permute.xlu1 %1335  ;;  %v816_v63 = vld [vmem:[#allocation3 + $0x20] sm:$0xc]  ;;  %v813_v16 = vld [vmem:[#allocation3 + $0x18] sm:$0xc]  ;;  %v556_v36 = vld [vmem:[#allocation3 + $0x10] sm:$0x30] }
  0xb8   : > { %555 = vst [vmem:[#allocation3 + $0x8] sm:$0x30] %v554_v37  ;;  %v1338_v39 = vunpack.i.h.bf16 %v1746_v27  ;;  %v1337_v40 = vunpack.i.l.bf16 %v1746_v27 }
  0xb9   : > { %v406_v42 = vpop.permute.xlu0 %405 }
  0xba   : > { %v670_v43 = vsel %vm668_vm10, %v1337_v40, %v1338_v39  ;;  %v414_v44 = vsel %vm413_vm0, %v406_v42, %v408_v25  ;;  %v429_v25 = vld [vmem:[#allocation3 + $0x10] sm:$0x6]  ;;  %v690_v42 = vld [vmem:[#allocation3 + $0x10] sm:$0x80] }
  0xbb   : > { %v424_v46 = vsel %vm1725_vm1, %v414_v44, %v423_v41  ;;  %v534_v24 = vpop.permute.xlu1 %533  ;;  %v688_v47 = vsel %vm1750_vm5, %v670_v43, %v687_v45 }
  0xbc   : > { %425 = vst [vmem:[#allocation3] sm:$0x6] %v424_v46  ;;  %v542_v49 = vsel %vm541_vm4, %v534_v24, %v536_v15  ;;  %689 = vst [vmem:[#allocation3 + $0x8] sm:$0x80] %v688_v47  ;;  %v862_v46 = vld [vmem:[#allocation3 + $0x28] sm:$0x30] }
  0xbd   : > { %v551_v50 = vsel %vm1736_vm6, %v542_v49, %v550_v48  ;;  %v653_v51 = vpop.permute.xlu0 %652  ;;  %v1345_v49 = vld [vmem:[%s1891_s2 + $0x8] sm:$0xff]  }
  0xbe   : > { %552 = vst [vmem:[#allocation3] sm:$0x30] %v551_v50  ;;  %v669_v53 = vsel %vm668_vm10, %v653_v51, %v1337_v40 }
  0xbf   : > { %v685_v55 = vsel %vm1750_vm5, %v669_v53, %v684_v52  ;;  %v726_v56 = vpop.permute.xlu1 %725 }
  0xc0   : > { %686 = vst [vmem:[#allocation3] sm:$0x80] %v685_v55  ;;  %v730_v57 = vsel %vm727_vm12, %v1704_v6, %v726_v56  ;;  %vm849_vm12 = vcmask 736256  }
  0xc1   : > { %v743_v58 = vsel %vm1711_vm13, %v730_v57, %v742_v54  ;;  %v799_v59 = vpop.permute.xlu0 %798 }
  0xc2   : > { %744 = vst [vmem:[#allocation3 + $0x28] sm:$0x6] %v743_v58 }
  0xc3   : > { %v801_v61 = vpop.permute.xlu1 %800  ;;  %v870_v62 = vld [vmem:[#allocation3 + $0x8] sm:$0xff] }
  0xc4   : > { %v806_v1 = vsel %vm804_vm15, %v799_v59, %v801_v61  ;;  %916 = vmatprep.subr.bf16.mxu0 %v870_v62 }
  0xc5   : > { %v817_v3 = vsel %vm1773_vm3, %v806_v1, %v816_v63  ;;  %v844_v4 = vpop.permute.xlu0 %843 }
  0xc6   : > { %818 = vst [vmem:[#allocation3 + $0x20] sm:$0xc] %v817_v3 }
  0xc7   : > { %v846_v6 = vpop.permute.xlu1 %845  ;;  %v869_v7 = vld [vmem:[#allocation3] sm:$0xff] }
  0xc8   : > { %v851_v8 = vsel %vm849_vm12, %v844_v4, %v846_v6  ;;  %917 = vmatpush1.bf16.msra.mxu0 %v869_v7 }
  0xc9   : > { %v860_v9 = vsel %vm1529_vm9, %v851_v8, %v859_v5  ;;  %v663_v10 = vpop.permute.xlu0 %662  ;;  %v819_v44 = vld [vmem:[#allocation3 + $0x28] sm:$0xc] }
  0xca   : > { %861 = vst [vmem:[#allocation3 + $0x20] sm:$0x30] %v860_v9 }
  0xcb   : > { %v665_v11 = vpop.permute.xlu1 %664 }
  0xcc   : > { %v673_v12 = vsel %vm668_vm10, %v663_v10, %v665_v11 }
  0xcd   : > { %694 = vst [vmem:[#allocation3 + $0x20] sm:$0x1] %v673_v12  ;;  %v797_v14 = vpop.permute.xlu0 %796 }
  0xce   : > { %v805_v17 = vsel %vm804_vm15, %v797_v14, %v799_v59 }
  0xcf   : > { %v814_v20 = vsel %vm1773_vm3, %v805_v17, %v813_v16  ;;  %v842_v21 = vpop.permute.xlu1 %841 }
  0xd0   : > { %815 = vst [vmem:[#allocation3 + $0x18] sm:$0xc] %v814_v20  ;;  %v850_v22 = vsel %vm849_vm12, %v842_v21, %v844_v4 }
  0xd1   : > { %v857_v23 = vsel %vm1529_vm9, %v850_v22, %v856_v18  ;;  %v661_v13 = vpop.permute.xlu0 %660 }
  0xd2   : > { %858 = vst [vmem:[#allocation3 + $0x18] sm:$0x30] %v857_v23  ;;  %v672_v0 = vsel %vm668_vm10, %v661_v13, %v663_v10 }
  0xd3   : > { %693 = vst [vmem:[#allocation3 + $0x18] sm:$0x1] %v672_v0  ;;  %v412_v29 = vpop.permute.xlu1 %411 }
  0xd4   : > { %v416_v32 = vsel %vm413_vm0, %v1729_v30, %v412_v29  ;;  %v873_v33 = vld [vmem:[#allocation3 + $0x20] sm:$0xff] }
  0xd5   : > { %v430_v15 = vsel %vm1725_vm1, %v416_v32, %v429_v25  ;;  %v540_v35 = vpop.permute.xlu0 %539  ;;  %918 = vmatprep.subr.bf16.mxu0 %v873_v33 }
  0xd6   : > { %431 = vst [vmem:[#allocation3 + $0x10] sm:$0x6] %v430_v15  ;;  %v544_v37 = vsel %vm541_vm4, %v1740_v34, %v540_v35 }
  0xd7   : > { %v557_v40 = vsel %vm1736_vm6, %v544_v37, %v556_v36  ;;  %v659_v41 = vpop.permute.xlu1 %658 }
  0xd8   : > { %558 = vst [vmem:[#allocation3 + $0x10] sm:$0x30] %v557_v40  ;;  %v671_v30 = vsel %vm668_vm10, %v1338_v39, %v659_v41 }
  0xd9   : > { %v691_v26 = vsel %vm1750_vm5, %v671_v30, %v690_v42  ;;  %v803_v43 = vpop.permute.xlu0 %802 }
  0xda   : > { %692 = vst [vmem:[#allocation3 + $0x10] sm:$0x80] %v691_v26  ;;  %v807_v45 = vsel %vm804_vm15, %v801_v61, %v803_v43  ;;  %v872_v34 = vld [vmem:[#allocation3 + $0x18] sm:$0xff] }
  0xdb   : > { %v820_v28 = vsel %vm1773_vm3, %v807_v45, %v819_v44  ;;  %v848_v24 = vpop.permute.xlu1 %847  ;;  %919 = vmatpush1.bf16.msra.mxu0 %v872_v34 }
  0xdc   : > { %821 = vst [vmem:[#allocation3 + $0x28] sm:$0xc] %v820_v28  ;;  %v852_v27 = vsel %vm849_vm12, %v846_v6, %v848_v24 }
  0xdd   : > { %v863_v39 = vsel %vm1529_vm9, %v852_v27, %v862_v46  ;;  %v667_v19 = vpop.permute.xlu0 %666 }
  0xde   : > { %864 = vst [vmem:[#allocation3 + $0x28] sm:$0x30] %v863_v39  ;;  %v674_v47 = vsel %vm668_vm10, %v665_v11, %v667_v19  ;;  %1226 = vmatmul.mubr.msk.bf16.vlgmr.msra.gmra.mrb[0].mxu0 %vm909_vm14, %v1655_v31 }
  0xdf   : > { %695 = vst [vmem:[#allocation3 + $0x28] sm:$0x1] %v674_v47  ;;  %958 = vmatprep.mubr.bf16.mxu0 %v1435_v38 }
  0xe1   : > { %v871_v48 = vld [vmem:[#allocation3 + $0x10] sm:$0xff] }
  0xe2   : > { %1257 = vmatprep.subr.bf16.mxu1 %v871_v48 }
  0xe3   : > { %1258 = vmatpush3.bf16.msra.mxu1 %v871_v48 }
  0xe6   : > { %1227 = vmatmul.mubr.msk.bf16.gmra.mrb[4].mxu0 %vm909_vm14, %v1345_v49  ;;  %v874_v2 = vld [vmem:[#allocation3 + $0x28] sm:$0xff] }
  0xe7   : > { %1259 = vmatprep.subr.bf16.mxu1 %v874_v2 }
  0xe8   : > { %1260 = vmatpush3.bf16.msra.mxu1 %v874_v2 }
  0xeb   : > { %1262 = vmatmul.mubr.msk.bf16.vlgmr.msra.gmra.mrb[0].mxu1 %vm909_vm14, %v1345_v49 }
  0xec   : > { %v882_v50 = vpop.permute.xlu1 %881 }
  0xee   : > { %v887_v51 = vpop.permute.xlu0 %886 }
  0xf0   : > { %v892_v60 = vpop.permute.xlu1 %891 }
  0xf4   : > { %v897_v10 = vpop.permute.xlu1 %896 }
 0x1b1   : > { %v950_v31 = vpop.f32.mrb[0].mxu0 }
 0x1b2   : > { %v951_v38 = vadd.f32 %v950_v31, %v882_v50  ;;  %v952_v52 = vpop.f32.mrb[1].mxu0 }
 0x1b3   : > { %v953_v53 = vadd.f32 %v952_v52, %v882_v50  ;;  %v954_v54 = vpop.f32.mrb[2].mxu0 }
 0x1b4   : > { %vm1018_vm2 = vcmp.ge.f32.partialorder %v951_v38, 0.0  ;;  %v1030_v55 = vmul.f32 0.2, %v951_v38  ;;  %v955_v56 = vadd.f32 %v954_v54, %v887_v51  ;;  %v956_v57 = vpop.f32.mrb[3].mxu0 }
 0x1b5   : > { %vm1019_vm9 = vcmp.ge.f32.partialorder %v953_v53, 0.0  ;;  %v1031_v58 = vmul.f32 0.2, %v953_v53  ;;  %v957_v59 = vadd.f32 %v956_v57, %v887_v51 }
 0x1b6   : > { %v1042_v61 = vsel %vm1018_vm2, %v951_v38, %v1030_v55  ;;  %vm1021_vm14 = vcmp.ge.f32.partialorder %v955_v56, 0.0  ;;  %v1033_v62 = vmul.f32 0.2, %v955_v56 }
 0x1b7   : > { %v1043_v63 = vsel %vm1019_vm9, %v953_v53, %v1031_v58  ;;  %vm1022_vm13 = vcmp.ge.f32.partialorder %v957_v59, 0.0  ;;  %v1034_v1 = vmul.f32 0.2, %v957_v59 }
 0x1b8   : > { %v1244_v3 = vpack.c.bf16 %v1043_v63, %v1042_v61  ;;  %v1045_v4 = vsel %vm1021_vm14, %v955_v56, %v1033_v62 }
 0x1b9   : > { %v1046_v5 = vsel %vm1022_vm13, %v957_v59, %v1034_v1  ;;  %v960_v6 = vpop.f32.mrb[4].mxu0 }
 0x1ba   : > { %1094 = vst [vmem:[%s1822_s26] sm:$0xff] %v1244_v3  ;;  %v1246_v7 = vpack.c.bf16 %v1046_v5, %v1045_v4  ;;  %v961_v8 = vadd.f32 %v960_v6, %v892_v60  ;;  %v962_v9 = vpop.f32.mrb[5].mxu0 }
 0x1bb   : > { %v963_v11 = vadd.f32 %v962_v9, %v892_v60  ;;  %v964_v12 = vpop.f32.mrb[6].mxu0 }
 0x1bc   : > { %1096 = vst [vmem:[%s1822_s26 + $0xc] sm:$0xff] %v1246_v7  ;;  %vm1024_vm0 = vcmp.ge.f32.partialorder %v961_v8, 0.0  ;;  %v1036_v14 = vmul.f32 0.2, %v961_v8  ;;  %v965_v16 = vadd.f32 %v964_v12, %v897_v10  ;;  %v966_v17 = vpop.f32.mrb[7].mxu0 }
 0x1bd   : > { %vm1025_vm1 = vcmp.ge.f32.partialorder %v963_v11, 0.0  ;;  %v1037_v18 = vmul.f32 0.2, %v963_v11  ;;  %v967_v20 = vadd.f32 %v966_v17, %v897_v10 }
 0x1be   : > { %v1048_v21 = vsel %vm1024_vm0, %v961_v8, %v1036_v14  ;;  %vm1027_vm4 = vcmp.ge.f32.partialorder %v965_v16, 0.0  ;;  %v1039_v22 = vmul.f32 0.2, %v965_v16  ;;  %v1263_v23 = vpop.f32.mrb[0].mxu1 }
 0x1bf   : > { %v1049_v13 = vsel %vm1025_vm1, %v963_v11, %v1037_v18  ;;  %vm1028_vm6 = vcmp.ge.f32.partialorder %v967_v20, 0.0  ;;  %v1040_v0 = vmul.f32 0.2, %v967_v20  ;;  %v1012_v25 = vadd.f32 %v1263_v23, %v892_v60  ;;  %v1003_v29 = vpop.f32.mrb[1].mxu1 }
 0x1c0   : > { %v1248_v32 = vpack.c.bf16 %v1049_v13, %v1048_v21  ;;  %v1051_v33 = vsel %vm1027_vm4, %v965_v16, %v1039_v22  ;;  %v1004_v15 = vadd.f32 %v1003_v29, %v882_v50  ;;  %v1264_v35 = vpop.f32.mrb[2].mxu1 }
 0x1c1   : > { %v1052_v36 = vsel %vm1028_vm6, %v967_v20, %v1040_v0  ;;  %vm1026_vm7 = vcmp.ge.f32.partialorder %v1012_v25, 0.0  ;;  %v1038_v37 = vmul.f32 0.2, %v1012_v25  ;;  %v1015_v40 = vadd.f32 %v1264_v35, %v897_v10  ;;  %v1006_v41 = vpop.f32.mrb[3].mxu1 }
 0x1c2   : > { %1098 = vst [vmem:[%s1822_s26 + $0x18] sm:$0xff] %v1248_v32  ;;  %v1250_v42 = vpack.c.bf16 %v1052_v36, %v1051_v33  ;;  %vm1020_vm8 = vcmp.ge.f32.partialorder %v1004_v15, 0.0  ;;  %v1032_v30 = vmul.f32 0.2, %v1004_v15  ;;  %v1007_v26 = vadd.f32 %v1006_v41, %v887_v51 }
 0x1c3   : > { %v1050_v43 = vsel %vm1026_vm7, %v1012_v25, %v1038_v37  ;;  %vm1029_vm10 = vcmp.ge.f32.partialorder %v1015_v40, 0.0  ;;  %v1041_v44 = vmul.f32 0.2, %v1015_v40 }
 0x1c4   : > { %1100 = vst [vmem:[%s1822_s26 + $0x24] sm:$0xff] %v1250_v42  ;;  %v1249_v45 = vpack.c.bf16 %v1050_v43, %v1050_v43  ;;  %v1044_v46 = vsel %vm1020_vm8, %v1004_v15, %v1032_v30  ;;  %vm1023_vm5 = vcmp.ge.f32.partialorder %v1007_v26, 0.0  ;;  %v1035_v34 = vmul.f32 0.2, %v1007_v26 }
 0x1c5   : > { %v1245_v28 = vpack.c.bf16 %v1044_v46, %v1044_v46  ;;  %v1053_v24 = vsel %vm1029_vm10, %v1015_v40, %v1041_v44 }
 0x1c6   : > { %1099 = vst [vmem:[%s1822_s26 + $0x20] sm:$0xf] %v1249_v45  ;;  %v1251_v27 = vpack.c.bf16 %v1053_v24, %v1053_v24  ;;  %v1047_v39 = vsel %vm1023_vm5, %v1007_v26, %v1035_v34 }
 0x1c7   : > { %1095 = vst [vmem:[%s1822_s26 + $0x8] sm:$0xf] %v1245_v28  ;;  %v1247_v19 = vpack.c.bf16 %v1047_v39, %v1047_v39 }
 0x1c8   : > { %1101 = vst [vmem:[%s1822_s26 + $0x2c] sm:$0xf] %v1251_v27 }
 0x1c9   : > { %1097 = vst [vmem:[%s1822_s26 + $0x14] sm:$0xf] %v1247_v19 }
 0x1ca   : > { %1359 = shalt.err (!%p1356_p5)
}
 0x1cb   : > { %s1360_s12 = scalar_lea.hbm %s1834_s6, 768  ;;  %s1364_s21 = scalar_lea.hbm %s1893_s4, 1536 }
 0x1cc   : > { %p1361_p6 = scmp.ne.s32.totalorder %s1834_s6, %s1360_s12  ;;  %p1365_p10 = scmp.lt.u32.totalorder %s1834_s6, %s1893_s4 }
 0x1cd   : > { %p1366_p11 = scmp.lt.u32.totalorder %s1364_s21, %s1360_s12  ;;  %p1368_p13 = scmp.lt.u32.totalorder %s1360_s12, %s1834_s6 }
 0x1ce   : > { %p1362_p7 = pnand %p1361_p6, %p1504_p4 }
 0x1cf   : > { %p1367_p12 = por %p1366_p11, %p1365_p10 }
 0x1d0   : > { %p1363_p9 = pneg %p1362_p7 }
 0x1d1   : > { %p1369_p0 = por %p1368_p13, %p1367_p12 }
 0x1d3   : > { %p1370_p1 = pnand %p1369_p0, %p1363_p9 }
 0x1d5   : > { %1373 = shalt.err (!%p1370_p1)
}
 0x1d6   : > { %s1437_s26 = smov 192   ;;  %s1438_s29 = smov 12  }
 0x1d7   : > { %1267 = dma.vmem_to_hbm [thread:$0]  (%p1504_p4), %s1836_s30, 768, %s1834_s6, %s1843_s7, %s1437_s26, %s1437_s26, %s1438_s29  }
 0x1d8 PF: > { %p1273_p2 = scmp.ge.s32.totalorder %s1424_s20, 2  ;;  %s1133_s18 = sand.u32 1, %s1404_s15  }
 0x1d9   : > { %s1134_s5 = scalar_lea.sflag [#allocation5], %s1133_s18 }
 0x1da   : > { %p1270_p3 = pnand %p1273_p2, %p1511_p8 }
 0x1dc   : > { %1399 = dma.done.wait (!%p1270_p3), %s1134_s5, 768  }
 0x1dd   : > { %1401 = vsyncadd (!%p1270_p3), %s1134_s5, 4294966528  ;;  %s17_s20 = sadd.s32 1, %s1424_s20   ;;  %s1916_s15 = smov %s1408_s16 }
 0x1de   : > { %p14_p5 = scmp.ge.s32.totalorder %s17_s20, 4   ;;  %s1917_s16 = smov %s1412_s17 }
 0x1df   : > { %s1918_s17 = smov %s1517_s28  ;;  %s1919_s18 = smov %s1420_s19 }
 0x1e0   : > { %s1920_s19 = smov %s1922_s23  ;;  %16 = sbr.rel (!%p14_p5) target bundleno = 4 (0x4), region = 74 }
 0x1e7   :  { %1139 = vsyncpa [#allocation5], 1 }
 0x1e8   :  { %1141 = vsyncpa [#allocation5 + $0x1], 1 }

</bundles_post_ra>
